<compile_context>
chip_gen: v6e
topology: v6e:2x2x1
jax: 0.10.0
libtpu: 0.0.40
codegen_flags: <defaults>
</compile_context>

<pallas_src>
import functools

import jax
import jax.numpy as jnp
from jax.experimental import pallas as pl
from jax.experimental.pallas import tpu as pltpu

_LANE = 128


def _ca_kernel(x_ref, w1t_ref, w2t_ref, o_ref, sum_acc, max_acc, *,
               hw_total, hw_tile, grid_k):
    # x_ref:   (nb, C, hw_tile)   one batch block, one HW tile (pipelined)
    # w1t_ref: (C, C_hid)         resident across the whole grid
    # w2t_ref: (C_hid, C_out)
    # o_ref:   (1, nb, C_out)     written once, in the epilogue
    # sum_acc: (nb, C, 128) f32   per-lane partial sums
    # max_acc: (nb, C, 128) f32   per-lane partial maxima
    k = pl.program_id(1)

    @pl.when(k == 0)
    def _init():
        sum_acc[...] = jnp.zeros_like(sum_acc)
        max_acc[...] = jnp.full_like(max_acc, -jnp.inf)

    n_chunks = hw_tile // _LANE

    def accum_chunk(j, valid_count=None):
        # Read one 128-lane chunk straight from the ref; never materialize the
        # whole tile as a value.
        chunk = x_ref[:, :, j * _LANE:(j + 1) * _LANE].astype(jnp.float32)
        if valid_count is None:
            c_sum = chunk
            c_max = chunk
        else:
            lane = jax.lax.broadcasted_iota(jnp.int32, chunk.shape, 2)
            valid = lane < valid_count
            c_sum = jnp.where(valid, chunk, 0.0)
            c_max = jnp.where(valid, chunk, -jnp.inf)
        sum_acc[...] += c_sum
        max_acc[...] = jnp.maximum(max_acc[...], c_max)

    def accum_full_step():
        for j in range(n_chunks):
            accum_chunk(j)

    def accum_last_step():
        base = (grid_k - 1) * hw_tile
        for j in range(n_chunks):
            start = base + j * _LANE
            if start + _LANE <= hw_total:
                accum_chunk(j)                                   # fully valid
            elif start < hw_total:
                accum_chunk(j, valid_count=hw_total - start)     # ragged chunk
            # else: chunk lies entirely past H*W -> skip.

    ragged = (grid_k * hw_tile != hw_total)
    if not ragged:
        accum_full_step()
    elif grid_k == 1:
        accum_last_step()
    else:
        @pl.when(k < grid_k - 1)
        def _full_steps():
            accum_full_step()

        @pl.when(k == grid_k - 1)
        def _last_step():
            accum_last_step()

    @pl.when(k == grid_k - 1)
    def _finalize():
        nb = sum_acc.shape[0]
        # Single cross-lane reduce per pooled quantity (XLU, once per batch block).
        avg = jnp.sum(sum_acc[...], axis=2) * jnp.float32(1.0 / hw_total)   # (nb, C)
        mx = jnp.max(max_acc[...], axis=2)                                  # (nb, C)

        # Fused fc(): one stacked matmul pair for both pooled branches.
        z = jnp.concatenate([avg, mx], axis=0)                              # (2*nb, C)
        w1t = w1t_ref[...].astype(jnp.float32)                              # (C, C_hid)
        w2t = w2t_ref[...].astype(jnp.float32)                              # (C_hid, C_out)
        h = jnp.maximum(
            jnp.dot(z, w1t, preferred_element_type=jnp.float32), 0.0)       # (2*nb, C_hid)
        y = jnp.dot(h, w2t, preferred_element_type=jnp.float32)             # (2*nb, C_out)

        out = y[0:nb, :] + y[nb:2 * nb, :]                                  # (nb, C_out)
        o_ref[0] = jax.nn.sigmoid(out).astype(o_ref.dtype)


def channel_attention(x, w1, w2, *,
                      vmem_limit_bytes=48 * 1024 * 1024,
                      block_budget_bytes=40 * 1024 * 1024,
                      max_chunks_per_step=64):
    """x:  (N, C_in, H, W)
       w1: (C_hid, C_in)  -- Conv2d(C_in, C_hid, 1, bias=False).weight[:, :, 0, 0]
       w2: (C_out, C_hid) -- Conv2d(C_hid, C_out, 1, bias=False).weight[:, :, 0, 0]
       returns (N, C_out, 1, 1)"""
    N, C, H, W = x.shape
    C_hid = w1.shape[0]
    C_out = w2.shape[0]
    HW = H * W

    x_flat = x.reshape(N, C, HW)
    w1t = jnp.transpose(w1)   # (C, C_hid)
    w2t = jnp.transpose(w2)   # (C_hid, C_out)

    itemsize = x.dtype.itemsize
    w_itemsize = w1.dtype.itemsize

    def rup(a, b):
        return ((a + b - 1) // b) * b

    def rdn(a, b):
        return (a // b) * b

    hw_full = rup(HW, _LANE)

    # Resident weights (counted twice: Pallas may double-buffer constant blocks).
    weight_bytes = 2 * (C * C_hid + C_hid * C_out) * w_itemsize

    # Batch block: aim for >= 2 batch-grid steps so the "parallel" axis can shard
    # across v7x's two TensorCores; snap nb down to a divisor of N so every block
    # is full (no out-of-bounds batch rows); shrink further if VMEM-tight.
    nb = max(1, (N + 1) // 2)

    def fits(nb_):
        scratch = 2 * nb_ * C * _LANE * 4                   # f32 sum/max accumulators
        x_min = 2 * nb_ * C * _LANE * itemsize              # double-buffered 128-lane block
        return weight_bytes + scratch + x_min <= block_budget_bytes

    while nb > 1 and (N % nb != 0 or not fits(nb)):
        nb -= 1

    # Largest lane-aligned hw_tile whose double-buffered block (+ scratch + weights)
    # fits the byte budget; cap the unrolled chunk count.
    scratch_bytes = 2 * nb * C * _LANE * 4
    avail = max(0, block_budget_bytes - weight_bytes - scratch_bytes)
    per_elem = max(1, 2 * nb * C * itemsize)                # double-buffered x, per HW pos
    hw_cap = max(_LANE, rdn(avail // per_elem, _LANE))
    hw_cap = min(hw_cap, max_chunks_per_step * _LANE)
    hw_tile = min(hw_full, hw_cap)

    grid_k = int(pl.cdiv(HW, hw_tile))
    grid_b = N // nb                                        # exact: nb | N

    kernel = functools.partial(_ca_kernel, hw_total=HW, hw_tile=hw_tile,
                               grid_k=grid_k)

    out = pl.pallas_call(
        kernel,
        out_shape=jax.ShapeDtypeStruct((grid_b, nb, C_out), x.dtype),
        grid_spec=pltpu.PrefetchScalarGridSpec(
            num_scalar_prefetch=0,
            grid=(grid_b, grid_k),
            in_specs=[
                pl.BlockSpec((nb, C, hw_tile), lambda b, k: (b, 0, k)),
                pl.BlockSpec((C, C_hid), lambda b, k: (0, 0)),
                pl.BlockSpec((C_hid, C_out), lambda b, k: (0, 0)),
            ],
            out_specs=pl.BlockSpec((1, nb, C_out), lambda b, k: (b, 0, 0)),
            scratch_shapes=[
                pltpu.VMEM((nb, C, _LANE), jnp.float32),   # per-lane partial sums
                pltpu.VMEM((nb, C, _LANE), jnp.float32),   # per-lane partial maxima
            ],
        ),
        compiler_params=pltpu.CompilerParams(
            dimension_semantics=("parallel", "arbitrary"),
            vmem_limit_bytes=vmem_limit_bytes,
        ),
    )(x_flat, w1t, w2t)

    return out.reshape(N, C_out, 1, 1)


def reference(x, w1, w2):
    # Pure-JAX reference of the PyTorch forward.
    avg = jnp.mean(x, axis=(2, 3))                       # (N, C)
    mx = jnp.max(x, axis=(2, 3))                         # (N, C)

    def fc(z):
        h = jnp.maximum(z @ w1.T, 0.0)
        return h @ w2.T

    out = jax.nn.sigmoid(fc(avg) + fc(mx))
    return out[:, :, None, None]


if __name__ == "__main__":
    # Module config: in_channels=32, out_channels=32, reduction=8 -> hidden = 4
    in_channels, out_channels, reduction = 32, 32, 8
    hidden = out_channels // reduction

    key = jax.random.PRNGKey(0)
    kx, k1, k2, kx2 = jax.random.split(key, 4)

    # Deterministic synthetic conv weights (Conv2d(..., kernel_size=1, bias=False))
    w1 = jax.random.normal(k1, (hidden, in_channels), dtype=jnp.float32) * 0.1
    w2 = jax.random.normal(k2, (out_channels, hidden), dtype=jnp.float32) * 0.1

    # Case 1: lane-aligned spatial size (H*W = 256).
    N, H, W = 2, 16, 16
    x = jax.random.normal(kx, (N, in_channels, H, W), dtype=jnp.float32)
    out = jax.block_until_ready(channel_attention(x, w1, w2))
    ref = reference(x, w1, w2)
    assert out.shape == (N, out_channels, 1, 1), out.shape
    assert jnp.allclose(out, ref, atol=1e-5, rtol=1e-5), (
        float(jnp.max(jnp.abs(out - ref))))

    # Case 2: ragged spatial (H*W = 169, not a multiple of 128) and odd batch (N=3)
    # to exercise the masked last chunk and the nb | N snapping.
    N2, H2, W2 = 3, 13, 13
    x2 = jax.random.normal(kx2, (N2, in_channels, H2, W2), dtype=jnp.float32)
    out2 = jax.block_until_ready(channel_attention(x2, w1, w2))
    ref2 = reference(x2, w1, w2)
    assert out2.shape == (N2, out_channels, 1, 1), out2.shape
    assert jnp.allclose(out2, ref2, atol=1e-5, rtol=1e-5), (
        float(jnp.max(jnp.abs(out2 - ref2))))

    print("KERNEL_OK")
</pallas_src>

<mosaic_0001>
module attributes {stable_mosaic.version = 11 : i64} {
  func.func @_ca_kernel(%arg0: i32, %arg1: i32, %arg2: memref<1x32x256xf32, #tpu.memory_space<vmem>>, %arg3: memref<32x4xf32, #tpu.memory_space<vmem>>, %arg4: memref<4x32xf32, #tpu.memory_space<vmem>>, %arg5: memref<1x1x32xf32, #tpu.memory_space<vmem>>, %arg6: memref<1x32x128xf32, #tpu.memory_space<vmem>>, %arg7: memref<1x32x128xf32, #tpu.memory_space<vmem>>) attributes {dimension_semantics = [#tpu.dimension_semantics<parallel>, #tpu.dimension_semantics<arbitrary>], iteration_bounds = array<i64: 2, 1>, scalar_prefetch = 0 : i64, scratch_operands = 2 : i64, tpu.core_type = #tpu.core_type<tc>, window_params = [{transform_indices = @transform_0, window_bounds = array<i64: 1, 32, 256>}, {pipeline_mode = #tpu.pipeline_mode<synchronous>, transform_indices = @transform_1, window_bounds = array<i64: 32, 4>}, {pipeline_mode = #tpu.pipeline_mode<synchronous>, transform_indices = @transform_2, window_bounds = array<i64: 4, 32>}, {transform_indices = @transform_3, window_bounds = array<i64: 1, 1, 32>}]} {
    %c0_i32 = arith.constant 0 : i32
    %0 = arith.cmpi eq, %arg1, %c0_i32 : i32
    %1 = arith.extui %0 : i1 to i32
    %c0_i32_0 = arith.constant 0 : i32
    %2 = arith.cmpi ne, %1, %c0_i32_0 : i32
    scf.if %2 {
      %cst = arith.constant 0.000000e+00 : f32
      %20 = vector.broadcast %cst : f32 to vector<1x32x128xf32>
      %c0_31 = arith.constant 0 : index
      %c0_32 = arith.constant 0 : index
      %c0_33 = arith.constant 0 : index
      %21 = vector.load %arg6[%c0_31, %c0_32, %c0_33] : memref<1x32x128xf32, #tpu.memory_space<vmem>>, vector<1x32x128xf32>
      tpu.vector_store %arg6[%c0_31, %c0_32, %c0_33], %20 {strides = array<i32>} : memref<1x32x128xf32, #tpu.memory_space<vmem>>, vector<1x32x128xf32>,
      %cst_34 = arith.constant 0xFF800000 : f32
      %22 = vector.broadcast %cst_34 : f32 to vector<1x32x128xf32>
      %c0_35 = arith.constant 0 : index
      %c0_36 = arith.constant 0 : index
      %c0_37 = arith.constant 0 : index
      %23 = vector.load %arg7[%c0_35, %c0_36, %c0_37] : memref<1x32x128xf32, #tpu.memory_space<vmem>>, vector<1x32x128xf32>
      tpu.vector_store %arg7[%c0_35, %c0_36, %c0_37], %22 {strides = array<i32>} : memref<1x32x128xf32, #tpu.memory_space<vmem>>, vector<1x32x128xf32>,
    } else {
    }
    %c0 = arith.constant 0 : index
    %c0_1 = arith.constant 0 : index
    %c0_2 = arith.constant 0 : index
    %3 = vector.load %arg2[%c0, %c0_1, %c0_2] : memref<1x32x256xf32, #tpu.memory_space<vmem>>, vector<1x32x128xf32>
    %c0_3 = arith.constant 0 : index
    %c0_4 = arith.constant 0 : index
    %c0_5 = arith.constant 0 : index
    %4 = vector.load %arg6[%c0_3, %c0_4, %c0_5] : memref<1x32x128xf32, #tpu.memory_space<vmem>>, vector<1x32x128xf32>
    %5 = arith.addf %4, %3 : vector<1x32x128xf32>
    %c0_6 = arith.constant 0 : index
    %c0_7 = arith.constant 0 : index
    %c0_8 = arith.constant 0 : index
    %6 = vector.load %arg6[%c0_6, %c0_7, %c0_8] : memref<1x32x128xf32, #tpu.memory_space<vmem>>, vector<1x32x128xf32>
    tpu.vector_store %arg6[%c0_6, %c0_7, %c0_8], %5 {strides = array<i32>} : memref<1x32x128xf32, #tpu.memory_space<vmem>>, vector<1x32x128xf32>,
    %c0_9 = arith.constant 0 : index
    %c0_10 = arith.constant 0 : index
    %c0_11 = arith.constant 0 : index
    %7 = vector.load %arg7[%c0_9, %c0_10, %c0_11] : memref<1x32x128xf32, #tpu.memory_space<vmem>>, vector<1x32x128xf32>
    %8 = arith.maximumf %7, %3 : vector<1x32x128xf32>
    %c0_12 = arith.constant 0 : index
    %c0_13 = arith.constant 0 : index
    %c0_14 = arith.constant 0 : index
    %9 = vector.load %arg7[%c0_12, %c0_13, %c0_14] : memref<1x32x128xf32, #tpu.memory_space<vmem>>, vector<1x32x128xf32>
    tpu.vector_store %arg7[%c0_12, %c0_13, %c0_14], %8 {strides = array<i32>} : memref<1x32x128xf32, #tpu.memory_space<vmem>>, vector<1x32x128xf32>,
    %c0_15 = arith.constant 0 : index
    %c0_16 = arith.constant 0 : index
    %c128 = arith.constant 128 : index
    %10 = vector.load %arg2[%c0_15, %c0_16, %c128] : memref<1x32x256xf32, #tpu.memory_space<vmem>>, vector<1x32x128xf32>
    %c0_17 = arith.constant 0 : index
    %c0_18 = arith.constant 0 : index
    %c0_19 = arith.constant 0 : index
    %11 = vector.load %arg6[%c0_17, %c0_18, %c0_19] : memref<1x32x128xf32, #tpu.memory_space<vmem>>, vector<1x32x128xf32>
    %12 = arith.addf %11, %10 : vector<1x32x128xf32>
    %c0_20 = arith.constant 0 : index
    %c0_21 = arith.constant 0 : index
    %c0_22 = arith.constant 0 : index
    %13 = vector.load %arg6[%c0_20, %c0_21, %c0_22] : memref<1x32x128xf32, #tpu.memory_space<vmem>>, vector<1x32x128xf32>
    tpu.vector_store %arg6[%c0_20, %c0_21, %c0_22], %12 {strides = array<i32>} : memref<1x32x128xf32, #tpu.memory_space<vmem>>, vector<1x32x128xf32>,
    %c0_23 = arith.constant 0 : index
    %c0_24 = arith.constant 0 : index
    %c0_25 = arith.constant 0 : index
    %14 = vector.load %arg7[%c0_23, %c0_24, %c0_25] : memref<1x32x128xf32, #tpu.memory_space<vmem>>, vector<1x32x128xf32>
    %15 = arith.maximumf %14, %10 : vector<1x32x128xf32>
    %c0_26 = arith.constant 0 : index
    %c0_27 = arith.constant 0 : index
    %c0_28 = arith.constant 0 : index
    %16 = vector.load %arg7[%c0_26, %c0_27, %c0_28] : memref<1x32x128xf32, #tpu.memory_space<vmem>>, vector<1x32x128xf32>
    tpu.vector_store %arg7[%c0_26, %c0_27, %c0_28], %15 {strides = array<i32>} : memref<1x32x128xf32, #tpu.memory_space<vmem>>, vector<1x32x128xf32>,
    %c0_i32_29 = arith.constant 0 : i32
    %17 = arith.cmpi eq, %arg1, %c0_i32_29 : i32
    %18 = arith.extui %17 : i1 to i32
    %c0_i32_30 = arith.constant 0 : i32
    %19 = arith.cmpi ne, %18, %c0_i32_30 : i32
    scf.if %19 {
      %c0_31 = arith.constant 0 : index
      %c0_32 = arith.constant 0 : index
      %c0_33 = arith.constant 0 : index
      %20 = vector.load %arg6[%c0_31, %c0_32, %c0_33] : memref<1x32x128xf32, #tpu.memory_space<vmem>>, vector<1x32x128xf32>
      %cst = arith.constant dense<0.000000e+00> : vector<1x32xf32>
      %21 = vector.multi_reduction <add>, %20, %cst [2] : vector<1x32x128xf32> to vector<1x32xf32>
      %cst_34 = arith.constant 3.906250e-03 : f32
      %22 = vector.broadcast %cst_34 : f32 to vector<1x32xf32>
      %23 = arith.mulf %21, %22 : vector<1x32xf32>
      %c0_35 = arith.constant 0 : index
      %c0_36 = arith.constant 0 : index
      %c0_37 = arith.constant 0 : index
      %24 = vector.load %arg7[%c0_35, %c0_36, %c0_37] : memref<1x32x128xf32, #tpu.memory_space<vmem>>, vector<1x32x128xf32>
      %cst_38 = arith.constant dense<0xFF800000> : vector<1x32xf32>
      %25 = vector.multi_reduction <maximumf>, %24, %cst_38 [2] : vector<1x32x128xf32> to vector<1x32xf32>
      %26 = tpu.concatenate %23, %25 in 0 : vector<1x32xf32>, vector<1x32xf32> -> vector<2x32xf32>
      %c0_39 = arith.constant 0 : index
      %c0_40 = arith.constant 0 : index
      %27 = vector.load %arg3[%c0_39, %c0_40] : memref<32x4xf32, #tpu.memory_space<vmem>>, vector<32x4xf32>
      %c0_41 = arith.constant 0 : index
      %c0_42 = arith.constant 0 : index
      %28 = vector.load %arg4[%c0_41, %c0_42] : memref<4x32xf32, #tpu.memory_space<vmem>>, vector<4x32xf32>
      %cst_43 = arith.constant dense<0.000000e+00> : vector<2x4xf32>
      %29 = tpu.matmul %26, %27, %cst_43 {dimension_numbers = #tpu.dot_dimension_numbers<[1], [0], [0], [1], [0, 0, 1, 1], [], []>} : vector<2x32xf32>, vector<32x4xf32>, vector<2x4xf32> -> vector<2x4xf32>
      %cst_44 = arith.constant 0.000000e+00 : f32
      %30 = vector.broadcast %cst_44 : f32 to vector<2x4xf32>
      %31 = arith.maximumf %29, %30 : vector<2x4xf32>
      %cst_45 = arith.constant dense<0.000000e+00> : vector<2x32xf32>
      %32 = tpu.matmul %31, %28, %cst_45 {dimension_numbers = #tpu.dot_dimension_numbers<[1], [0], [0], [1], [0, 0, 1, 1], [], []>} : vector<2x4xf32>, vector<4x32xf32>, vector<2x32xf32> -> vector<2x32xf32>
      %33 = vector.extract_strided_slice %32 {offsets = [0, 0], sizes = [1, 32], strides = [1, 1]} : vector<2x32xf32> to vector<1x32xf32>
      %34 = vector.extract_strided_slice %32 {offsets = [1, 0], sizes = [1, 32], strides = [1, 1]} : vector<2x32xf32> to vector<1x32xf32>
      %35 = arith.addf %33, %34 : vector<1x32xf32>
      %36 = arith.negf %35 : vector<1x32xf32>
      %37 = math.exp %36 : vector<1x32xf32>
      %cst_46 = arith.constant 1.000000e+00 : f32
      %38 = vector.broadcast %cst_46 : f32 to vector<1x32xf32>
      %39 = arith.addf %38, %37 : vector<1x32xf32>
      %40 = arith.divf %38, %39 : vector<1x32xf32>
      %c0_47 = arith.constant 0 : index
      %c0_48 = arith.constant 0 : index
      %c0_49 = arith.constant 0 : index
      %41 = vector.load %arg5[%c0_47, %c0_48, %c0_49] : memref<1x1x32xf32, #tpu.memory_space<vmem>>, vector<1x1x32xf32>
      %42 = vector.shape_cast %41 : vector<1x1x32xf32> to vector<1x32xf32>
      %43 = vector.shape_cast %40 : vector<1x32xf32> to vector<1x1x32xf32>
      tpu.vector_store %arg5[%c0_47, %c0_48, %c0_49], %43 {strides = array<i32>} : memref<1x1x32xf32, #tpu.memory_space<vmem>>, vector<1x1x32xf32>,
    } else {
    }
    return
  }
  func.func @transform_0(%arg0: i32, %arg1: i32) -> (i32, i32, i32) {
    %c0_i32 = arith.constant 0 : i32
    %c0_i32_0 = arith.constant 0 : i32
    return %arg0, %c0_i32, %arg1 : i32, i32, i32
  }
  func.func @transform_1(%arg0: i32, %arg1: i32) -> (i32, i32) {
    %c0_i32 = arith.constant 0 : i32
    %c0_i32_0 = arith.constant 0 : i32
    %c0_i32_1 = arith.constant 0 : i32
    return %c0_i32, %c0_i32_0 : i32, i32
  }
  func.func @transform_2(%arg0: i32, %arg1: i32) -> (i32, i32) {
    %c0_i32 = arith.constant 0 : i32
    %c0_i32_0 = arith.constant 0 : i32
    %c0_i32_1 = arith.constant 0 : i32
    return %c0_i32, %c0_i32_0 : i32, i32
  }
  func.func @transform_3(%arg0: i32, %arg1: i32) -> (i32, i32, i32) {
    %c0_i32 = arith.constant 0 : i32
    %c0_i32_0 = arith.constant 0 : i32
    %c0_i32_1 = arith.constant 0 : i32
    return %arg0, %c0_i32, %c0_i32_0 : i32, i32, i32
  }
}

</mosaic_0001>

<bundles_post_ra>
// kernel: tpu_custom_call.1
= control target key start
LH: loop header
LB: loop body
LE: loop exit
PB: predicated region body
PF: predicated region fallthrough
CT: control target
= control target key end

     0   :  { %8 = vsyncpa [#allocation5], 0  ;;  %s1024_s0 = inlined_call_operand.hbm [shape: f32[2,32,256], index: 0, kind: input, shape index: {}]   ;;  %s1025_s1 = inlined_call_operand.vmem [shape: f32[32,4], index: 1, kind: input, shape index: {}]   ;;  %s1026_s2 = inlined_call_operand.vmem [shape: f32[4,32], index: 2, kind: input, shape index: {}]   ;;  %s1027_s3 = inlined_call_operand.hbm [shape: f32[2,1,32], index: 3, kind: output, shape index: {}]  }
   0x1   :  { %10 = vsyncpa [#allocation5 + $0x1], 0 }
   0x2   :  { %11 = vsyncpa [#allocation6], 0 }
   0x3   :  { %13 = vsyncpa [#allocation6 + $0x1], 0  ;;  %s868_s12 = smov 0   ;;  %s870_s13 = smov 0  }
   0x4   :  { %s872_s14 = smov 0   ;;  %s874_s15 = smov 0  }
   0x5   :  { %s876_s16 = smov 0   ;;  %s878_s17 = smov 0  }
   0x6 LB: > { %s622_s18 = sadd.s32 4294967295, %s840_s17   ;;  %s623_s19 = sadd.s32 4294967294, %s840_s17   ;;  %s840_s17 = sphi %s878_s17, %s19_s17   ;;  %s836_s16 = sphi %s876_s16, %s1038_s16   ;;  %s832_s15 = sphi %s874_s15, %s1037_s15   ;;  %s828_s14 = sphi %s872_s14, %s1036_s14   ;;  %s824_s13 = sphi %s870_s13, %s1035_s13   ;;  %s820_s12 = sphi %s868_s12, %s1034_s12  }
   0x7   : > { %s31_s20 = sadd.s32 1, %s836_s16  ;;  %s40_s21 = sadd.s32 1, %s828_s14 }
   0x8   : > { %p33_p0 = scmp.ge.s32.totalorder %s31_s20, 2  ;;  %p47_p1 = scmp.ne.s32.totalorder %s828_s14, %s824_s13 }
   0x9   : > { %p48_p2 = scmp.eq.s32.totalorder %s840_s17, 0  ;;  %p53_p3 = scmp.ne.s32.totalorder %s824_s13, %s820_s12 }
   0xa   : > { %s1040_s20 = smov (%p33_p0, %s31_s20), 0  ;;  %p54_p5 = scmp.eq.s32.totalorder %s622_s18, 0 }
   0xb   : > { %p909_p4 = por %p48_p2, %p47_p1  ;;  %s35_s23 = ssub.s32 %s836_s16, %s1040_s20 }
   0xc   : > { %p119_p6 = scmp.eq.s32.totalorder %s622_s18, 1  ;;  %p38_p7 = scmp.eq.s32.totalorder %s35_s23, 0 }
   0xd   : > { %p915_p8 = por %p54_p5, %p53_p3  ;;  %p125_p10 = scmp.eq.s32.totalorder %s623_s19, 1 }
   0xe   : > { %p919_p9 = por %p119_p6, %p47_p1  ;;  %p674_p13 = scmp.lt.s32.totalorder %s840_s17, 2 }
   0xf   : > { %s924_s26 = scalar_select %p38_p7, %s828_s14, %s40_s21  }
  0x10   : > { %p926_p11 = por %p125_p10, %p53_p3  ;;  %s151_s28 = sand.u32 1, %s828_s14  }
  0x11   : > { %s626_s29 = sshll.u32 %s151_s28, 6  ;;  %s638_s30 = sshll.u32 %s836_s16, 10 }
  0x12   : > { %s163_s6 = scalar_lea.hbm %s1024_s0, %s638_s30  ;;  %s155_s7 = scalar_lea.vmem [#allocation4], %s626_s29 }
  0x13   : > { %s164_s8 = sshll.u32 %s155_s7, 4  ;;  %p939_p0 = pnand %p674_p13, %p909_p4  ;;  %s165_s8 = int_to_ptr.vmem [resolvable:$true] %s164_s8 }
  0x14   : > { %p629_p1 = scmp.ge.s32.totalorder %s840_s17, 1  ;;  %s152_s10 = scalar_lea.sflag [#allocation5], %s151_s28 }
  0x15   : > { %p734_p2 = pneg %p939_p0  ;;  %s745_s11 = scalar_lea.vmem %s165_s8, 1024 }
  0x16   : > { %p746_p3 = scmp.ne.s32.totalorder %s165_s8, %s745_s11  ;;  %s842_s18 = smov [#allocation4]  }
  0x17   : > { %s750_s19 = sshll.u32 %s842_s18, 4  ;;  %s751_s19 = int_to_ptr.vmem [resolvable:$false] %s750_s19 }
  0x18   : > { %p748_p5 = pnand %p746_p3, %p734_p2  ;;  %s752_s21 = scalar_lea.vmem %s751_s19, 2048 }
  0x19   : > { %p753_p7 = scmp.lt.s32.totalorder %s165_s8, %s751_s19  ;;  %p754_p10 = scmp.lt.s32.totalorder %s752_s21, %s745_s11 }
  0x1a   : > { %p749_p6 = pneg %p748_p5 }
  0x1b   : > { %p755_p12 = por %p754_p10, %p753_p7 }
  0x1d   : > { %p756_p4 = pnand %p755_p12, %p749_p6 }
  0x1f   : > { %759 = shalt.err (!%p756_p4)
}
  0x20   : > { %s843_s22 = smov 256   ;;  %s844_s23 = smov 16  }
  0x21   : > { %669 = dma.hbm_to_vmem [thread:$0]  (!%p939_p0), %s163_s6, 1024, %s165_s8, %s152_s10, %s843_s22, %s843_s22, %s844_s23  }
  0x22   : > { %p172_p13 = scmp.lt.s32.totalorder %s840_s17, 3 }
  0x24   : > { %p173_p2 = pnand %p629_p1, %p172_p13 }
  0x25   : > { %s952_s28 = sand.u32 (!%p173_p2), 1, %s824_s13  }
  0x26   : > { %176 = sbr.rel (%p173_p2) target bundleno = 640 (0x280), region = 32  ;;  %s630_s29 = sshll.u32 (!%p173_p2), %s952_s28, 6 }
  0x27   : > { %s179_s30 = scalar_lea.sflag (!%p173_p2), [#allocation5], %s952_s28  ;;  %s182_s4 = scalar_lea.vmem (!%p173_p2), [#allocation4], %s630_s29 }
  0x2b   : > { %811 = dma.done.wait (%p915_p8), %s179_s30, 1024  }
  0x2c   : > { %813 = vsyncadd (%p915_p8), %s179_s30, 4294966272  ;;  %v219_v0 = vld [vmem:[%s182_s4 + $0x20] sm:$0xff]  ;;  %v247_v1 = vld [vmem:[%s182_s4 + $0x28] sm:$0xff]  ;;  %v845_v16 = vmov 0.0   ;;  %vm846_vm0 = vmmov 0   ;;  %v308_v21 = vlaneseq  ;;  %vm319_vm1 = vcmask 130112  }
  0x2d   : > { %v217_v2 = vld [vmem:[%s182_s4] sm:$0xff]  ;;  %v255_v3 = vadd.f32 %v247_v1, %v219_v0  ;;  %v245_v4 = vld [vmem:[%s182_s4 + $0x8] sm:$0xff]  ;;  %v220_v5 = vld [vmem:[%s182_s4 + $0x30] sm:$0xff]  ;;  %v267_v15 = vmax.f32 %v219_v0, %v247_v1  ;;  %646 = vmatprep.subr.mxu0 %v845_v16  ;;  %657 = vmatprep.subr.mxu1 %v845_v16  ;;  %vm326_vm2 = vcmask 195712   ;;  %vm333_vm3 = vcmask 261312   ;;  %s635_s21 = sshll.u32 %s832_s15, 4 }
  0x2e   : > { %v248_v6 = vld [vmem:[%s182_s4 + $0x38] sm:$0xff]  ;;  %v253_v7 = vadd.f32 %v245_v4, %v217_v2  ;;  %v218_v8 = vld [vmem:[%s182_s4 + $0x10] sm:$0xff]  ;;  %v265_v13 = vmax.f32 %v217_v2, %v245_v4  ;;  %v363_v19 = vld [vmem:[%s1025_s1 + $0x8] sm:$0xff]  ;;  %654 = vmatprep.mubr.msk.f32.mxu0 %vm846_vm0, %v845_v16  ;;  %659 = vmatprep.mubr.msk.f32.mxu1 %vm846_vm0, %v845_v16  ;;  %v309_v22 = vand.u32 127, %v308_v21  ;;  %v311_v25 = vshrl.u32 %v308_v21, 7  ;;  %s203_s22 = scalar_lea.vmem [#allocation7], %s952_s28 }
  0x2f   : > { %v246_v9 = vld [vmem:[%s182_s4 + $0x18] sm:$0xff]  ;;  %284 = vadd.xlane.f32.xlu1 %v255_v3  ;;  %v256_v10 = vadd.f32 %v248_v6, %v220_v5  ;;  %v268_v14 = vmax.f32 %v220_v5, %v248_v6  ;;  %v364_v18 = vld [vmem:[%s1025_s1 + $0x10] sm:$0xff]  ;;  %v362_v20 = vld [vmem:[%s1025_s1] sm:$0xff]  ;;  %vm360_vm4 = vcmask 1040384   ;;  %vm367_vm5 = vcmask 261120   ;;  %s545_s23 = sshll.u32 %s203_s22, 4  ;;  %s982_s4 = scalar_lea.hbm %s1027_s3, %s635_s21  ;;  %s546_s23 = int_to_ptr.vmem [resolvable:$true] %s545_s23 }
  0x30   : > { %280 = vadd.xlane.f32.xlu0 %v253_v7  ;;  %v254_v11 = vadd.f32 %v246_v9, %v218_v8  ;;  %v266_v12 = vmax.f32 %v218_v8, %v246_v9  ;;  %v365_v17 = vld [vmem:[%s1025_s1 + $0x18] sm:$0xff]  ;;  %v314_v24 = vadd.s32 4294967288, %v309_v22  ;;  %v321_v27 = vadd.s32 4294967280, %v309_v22  ;;  %v366_v58 = vld [vmem:[%s1026_s2] sm:$0xf]  ;;  %s533_s24 = scalar_lea.sflag [#allocation6], %s952_s28 }
  0x31   : > { %647 = vmatpush3.msra.mxu0 %v365_v17  ;;  %v312_v30 = vsub.s32 %v309_v22, %v311_v25  ;;  %v328_v32 = vadd.s32 4294967272, %v309_v22  ;;  %vm446_vm6 = vcmask 1043456   ;;  %vm442_vm7 = vcmask 31744   ;;  %s760_s5 = scalar_lea.vmem %s546_s23, 16  ;;  %s847_s6 = smov [#allocation7]  }
  0x32   : > { %648 = vmatprep.subr.mxu0 %v845_v16  ;;  %v317_v29 = vsub.s32 %v314_v24, %v311_v25  ;;  %v324_v35 = vsub.s32 %v321_v27, %v311_v25  ;;  %658 = vmatpush3.msk.msra.mxu1 %vm446_vm6, %v366_v58  ;;  %vm530_vm8 = vcmask 253952   ;;  %p761_p8 = scmp.ne.s32.totalorder %s546_s23, %s760_s5  ;;  %s764_s7 = sshll.u32 %s847_s6, 4  ;;  %s765_s7 = int_to_ptr.vmem [resolvable:$false] %s764_s7 }
  0x33   : > { %286 = vadd.xlane.f32.xlu1 %v256_v10  ;;  %649 = vmatpush3.msra.mxu0 %v364_v18  ;;  %v331_v40 = vsub.s32 %v328_v32, %v311_v25  ;;  %s766_s15 = scalar_lea.vmem %s765_s7, 32  ;;  %p767_p1 = scmp.lt.s32.totalorder %s546_s23, %s765_s7 }
  0x34   : > { %282 = vadd.xlane.f32.xlu0 %v254_v11  ;;  %650 = vmatprep.subr.mxu0 %v845_v16  ;;  %p762_p12 = pnand %p761_p8, %p919_p9  ;;  %p768_p3 = scmp.lt.s32.totalorder %s766_s15, %s760_s5 }
  0x35   : > { %651 = vmatpush3.msra.mxu0 %v363_v19 }
  0x36   : > { %652 = vmatprep.subr.mxu0 %v845_v16  ;;  %p763_p0 = pneg %p762_p12  ;;  %p769_p5 = por %p768_p3, %p767_p1 }
  0x37   : > { %298 = vmax.xlane.f32.xlu1 %v266_v12  ;;  %653 = vmatpush3.msra.mxu0 %v362_v20 }
  0x38   : > { %296 = vmax.xlane.f32.xlu0 %v265_v13  ;;  %p770_p6 = pnand %p769_p5, %p763_p0 }
  0x3b   : > { %302 = vmax.xlane.f32.xlu1 %v268_v14 }
  0x3c   : > { %300 = vmax.xlane.f32.xlu0 %v267_v15 }
  0xb8   : > { %v285_v23 = vpop.xlane.xlu1 %284 }
  0xb9   : > { %v281_v26 = vpop.xlane.xlu0 %280  ;;  %v290_v36 = vmul.f32 0.00390625, %v285_v23 }
  0xba   : > { %v288_v31 = vmul.f32 0.00390625, %v281_v26 }
  0xbb   : > { %v325_v46 = vrot.slane %v290_v36, %v324_v35 }
  0xbc   : > { %v287_v28 = vpop.xlane.xlu1 %286  ;;  %v313_v39 = vrot.slane %v288_v31, %v312_v30 }
  0xbd   : > { %v283_v33 = vpop.xlane.xlu0 %282  ;;  %v291_v41 = vmul.f32 0.00390625, %v287_v28 }
  0xbe   : > { %v289_v34 = vmul.f32 0.00390625, %v283_v33 }
  0xbf   : > { %v332_v48 = vrot.slane %v291_v41, %v331_v40 }
  0xc0   : > { %v318_v37 = vrot.slane %v289_v34, %v317_v29  ;;  %v299_v38 = vpop.xlane.xlu1 %298 }
  0xc1   : > { %v297_v42 = vpop.xlane.xlu0 %296  ;;  %v347_v44 = vrot.slane %v299_v38, %v317_v29 }
  0xc2   : > { %v320_v43 = vsel %vm319_vm1, %v318_v37, %v313_v39  ;;  %v343_v45 = vrot.slane %v297_v42, %v312_v30 }
  0xc3   : > { %v327_v52 = vsel %vm326_vm2, %v325_v46, %v320_v43 }
  0xc4   : > { %v303_v47 = vpop.xlane.xlu1 %302  ;;  %v348_v53 = vsel %vm319_vm1, %v347_v44, %v343_v45  ;;  %v334_v56 = vsel %vm333_vm3, %v332_v48, %v327_v52 }
  0xc5   : > { %v301_v49 = vpop.xlane.xlu0 %300  ;;  %v357_v50 = vrot.slane %v303_v47, %v331_v40 }
  0xc6   : > { %v352_v51 = vrot.slane %v301_v49, %v324_v35 }
  0xc8   : > { %v353_v54 = vsel %vm326_vm2, %v352_v51, %v348_v53 }
  0xc9   : > { %v358_v55 = vsel %vm333_vm3, %v357_v50, %v353_v54 }
  0xca   : > { %v361_v57 = vsel %vm360_vm4, %v334_v56, %v358_v55 }
  0xcb   : > { %655 = vmatmul.mubr.msk.f32.vlgmr.msra.gmra.mxu0 %vm367_vm5, %v361_v57 }
 0x18b   : > { %v437_v59 = vpop.f32.mrf.mxu0 }
 0x18c   : > { %v441_v60 = vmax.f32 %v437_v59, 0.0 }
 0x18d   : > { %v656_v61 = vpop.f32.mrf.mxu0 }
 0x18e   : > { %660 = vmatmul.mubr.msk.f32.vlgmr.msra.gmra.mxu1 %vm442_vm7, %v441_v60 }
 0x24e   : > { %v516_v62 = vpop.f32.mrf.mxu1 }
 0x24f   : > { %v521_v63 = vrot.slane %v516_v62, 1 }
 0x250   : > { %v661_v0 = vpop.f32.mrf.mxu1 }
 0x251   : > { %v523_v1 = vadd.f32 %v521_v63, %v516_v62 }
 0x253   : > { %v634_v2 = vmul.f32 -1.442695, %v523_v1 }
 0x255   : > { %728 = vpow2.f32 %v634_v2 }
 0x262   : > { %v729_v3 = vpop.eup %728 }
 0x263   : > { %v527_v4 = vadd.f32 1.0, %v729_v3 }
 0x265   : > { %730 = vrcp.f32 %v527_v4 }
 0x272   : > { %v731_v5 = vpop.eup %730 }
 0x273   : > { %531 = vst.msk [vmem:[%s203_s22] sm:$0x1] %vm530_vm8, %v731_v5 }
 0x274   : > { %773 = shalt.err (!%p770_p6)
}
 0x275   : > { %s774_s8 = scalar_lea.hbm %s982_s4, 16  ;;  %s778_s10 = scalar_lea.hbm %s1027_s3, 32 }
 0x276   : > { %p775_p7 = scmp.ne.s32.totalorder %s982_s4, %s774_s8  ;;  %p779_p13 = scmp.lt.s32.totalorder %s982_s4, %s1027_s3 }
 0x277   : > { %p780_p2 = scmp.lt.s32.totalorder %s778_s10, %s774_s8 }
 0x278   : > { %p776_p10 = pnand %p775_p7, %p919_p9 }
 0x279   : > { %p781_p8 = por %p780_p2, %p779_p13 }
 0x27a   : > { %p777_p4 = pneg %p776_p10 }
 0x27c   : > { %p782_p12 = pnand %p781_p8, %p777_p4 }
 0x27e   : > { %785 = shalt.err (!%p782_p12)
}
 0x27f   : > { %664 = dma.vmem_to_hbm [thread:$0]  (%p919_p9), %s546_s23, 16, %s982_s4, %s533_s24  }
 0x280 PF: > { %s557_s19 = sand.u32 1, %s820_s12   ;;  %p1033_p0 = scmp.ge.s32.totalorder %s840_s17, 2 }
 0x281   : > { %s558_s21 = scalar_lea.sflag [#allocation6], %s557_s19 }
 0x282   : > { %p671_p1 = pnand %p1033_p0, %p926_p11 }
 0x284   : > { %p672_p3 = pneg %p671_p1 }
 0x286   : > { %815 = dma.done.wait (%p672_p3), %s558_s21, 16  }
 0x287   : > { %817 = vsyncadd (%p672_p3), %s558_s21, 4294967280  ;;  %s19_s17 = sadd.s32 1, %s840_s17   ;;  %s1034_s12 = smov %s824_s13 }
 0x288   : > { %p16_p5 = scmp.ge.s32.totalorder %s19_s17, 4   ;;  %s1035_s13 = smov %s828_s14 }
 0x289   : > { %s1036_s14 = smov %s924_s26  ;;  %s1037_s15 = smov %s836_s16 }
 0x28a   : > { %s1038_s16 = smov %s1040_s20  ;;  %18 = sbr.rel (!%p16_p5) target bundleno = 6 (0x6), region = 85 }
 0x28f   :  { %562 = vsyncpa [#allocation5], 1 }
 0x290   :  { %564 = vsyncpa [#allocation5 + $0x1], 1 }
 0x291   :  { %565 = vsyncpa [#allocation6], 1 }
 0x292   :  { %567 = vsyncpa [#allocation6 + $0x1], 1 }

</bundles_post_ra>
